<compile_context>
chip_gen: v5e
topology: v5e:2x2
jax: 0.10.0
libtpu: 0.0.40
codegen_flags: <defaults>
</compile_context>

<pallas_src>
import jax
import jax.numpy as jnp
from jax.experimental import pallas as pl
from jax.experimental.pallas import tpu as pltpu

_LANE = 128
_SUBLANE = 8
# ~2 MiB input block (f32) -> with output + double buffering ~8 MiB pipelined
# VMEM footprint: safe on v5e/v6e (32/128 MiB) and v7x (32/64 MiB).
_TARGET_BLOCK_BYTES = 2 * 1024 * 1024


def _myselu_kernel(x_ref, o_ref):
    x = x_ref[...].astype(jnp.float32)
    # x * 1 / (1 + exp(-x))  -- exact semantics of MYSELUImpl.forward
    o_ref[...] = (x * pl.reciprocal(1.0 + jnp.exp(-x))).astype(o_ref.dtype)


def _pick_block_rows(rows: int, itemsize: int) -> int:
    """Largest VMEM-friendly row block that still leaves >=~2 grid steps."""
    max_block_rows = (_TARGET_BLOCK_BYTES // (_LANE * itemsize))
    max_block_rows = max(_SUBLANE, (max_block_rows // _SUBLANE) * _SUBLANE)
    if rows <= _SUBLANE:
        return rows  # tiny input: one whole-array block (dims == array dims)
    # Aim for ~8 grid steps (>=2 needed so megacore/"parallel" can shard the
    # axis across v7x's 2 TensorCores), rounded up to a sublane multiple,
    # capped at the VMEM-friendly maximum.
    want = -(-rows // 8)                       # cdiv(rows, 8)
    want = -(-want // _SUBLANE) * _SUBLANE     # round up to multiple of 8
    return min(max_block_rows, want)


def myselu(x: jax.Array, param: jax.Array) -> jax.Array:
    """Forward of MYSELU. `param` is carried (as in the nn.Module) but unused
    by the forward math, exactly like the PyTorch reference."""
    del param  # not used in forward()
    orig_shape = x.shape
    orig_dtype = x.dtype
    n = x.size
    if n == 0:
        return x

    flat = x.reshape(-1)

    # Pad only to a 128-lane multiple; the sublane remainder is handled by the
    # cdiv grid's masked partial last block.
    n_pad = ((n + _LANE - 1) // _LANE) * _LANE
    padded = n_pad != n
    if padded:
        # TODO(synk): for lane-misaligned sizes this pad (+ final slice) costs
        # one extra HBM round-trip; a tiny tail call would eliminate it.
        flat = jnp.pad(flat, (0, n_pad - n))

    rows = n_pad // _LANE
    x2d = flat.reshape(rows, _LANE)  # bitcast when no pad was needed

    itemsize = jnp.dtype(orig_dtype).itemsize
    block_rows = _pick_block_rows(rows, itemsize)
    grid = (pl.cdiv(rows, block_rows),)

    out2d = pl.pallas_call(
        _myselu_kernel,
        out_shape=jax.ShapeDtypeStruct((rows, _LANE), orig_dtype),
        grid_spec=pltpu.PrefetchScalarGridSpec(
            num_scalar_prefetch=0,
            grid=grid,
            in_specs=[pl.BlockSpec((block_rows, _LANE), lambda i: (i, 0))],
            out_specs=pl.BlockSpec((block_rows, _LANE), lambda i: (i, 0)),
        ),
        compiler_params=pltpu.CompilerParams(
            dimension_semantics=("parallel",),
        ),
    )(x2d)

    out_flat = out2d.reshape(-1)
    if padded:
        out_flat = out_flat[:n]
    return out_flat.reshape(orig_shape)


def _ref(x):
    return x * (1.0 / (1.0 + jnp.exp(-x)))


if __name__ == "__main__":
    key = jax.random.PRNGKey(0)
    # NCHW input, consistent with how MYSELU is used after a conv in the script
    x = jax.random.normal(key, (2, 4, 16, 16), dtype=jnp.float32)

    # deterministic parameter init: MYSELU(num) -> torch.arange(num).float()
    num = 3
    param = jnp.arange(num, dtype=jnp.float32)

    out = jax.block_until_ready(myselu(x, param))
    ref = _ref(x)
    assert out.shape == x.shape and out.dtype == x.dtype
    assert float(jnp.max(jnp.abs(out - ref))) < 1e-5

    # Extra shapes: (2,3,16,16) exercises the cdiv-masked partial last block
    # (rows=12, block_rows=8); (3,5,7,11) exercises the 128-lane pad path.
    for shape in [(2, 3, 16, 16), (3, 5, 7, 11)]:
        xi = jax.random.normal(jax.random.PRNGKey(1), shape, dtype=jnp.float32)
        oi = jax.block_until_ready(myselu(xi, param))
        ri = _ref(xi)
        assert oi.shape == xi.shape and oi.dtype == xi.dtype
        assert float(jnp.max(jnp.abs(oi - ri))) < 1e-5

    print("KERNEL_OK")
</pallas_src>

<mosaic_0001>
module attributes {stable_mosaic.version = 11 : i64} {
  func.func @_myselu_kernel(%arg0: i32, %arg1: memref<8x128xf32, #tpu.memory_space<vmem>>, %arg2: memref<8x128xf32, #tpu.memory_space<vmem>>) attributes {dimension_semantics = [#tpu.dimension_semantics<parallel>], iteration_bounds = array<i64: 2>, scalar_prefetch = 0 : i64, scratch_operands = 0 : i64, tpu.core_type = #tpu.core_type<tc>, window_params = [{transform_indices = @transform_0, window_bounds = array<i64: 8, 128>}, {transform_indices = @transform_1, window_bounds = array<i64: 8, 128>}]} {
    %c0 = arith.constant 0 : index
    %c0_0 = arith.constant 0 : index
    %0 = vector.load %arg1[%c0, %c0_0] : memref<8x128xf32, #tpu.memory_space<vmem>>, vector<8x128xf32>
    %cst = arith.constant 0.000000e+00 : f32
    %1 = vector.broadcast %cst : f32 to vector<8x128xf32>
    %2 = arith.subf %1, %0 : vector<8x128xf32>
    %3 = math.exp %2 : vector<8x128xf32>
    %cst_1 = arith.constant 1.000000e+00 : f32
    %4 = vector.broadcast %cst_1 : f32 to vector<8x128xf32>
    %5 = arith.addf %4, %3 : vector<8x128xf32>
    %6 = tpu.reciprocal %5 : vector<8x128xf32> -> vector<8x128xf32>
    %7 = arith.mulf %0, %6 : vector<8x128xf32>
    %c0_2 = arith.constant 0 : index
    %c0_3 = arith.constant 0 : index
    %8 = vector.load %arg2[%c0_2, %c0_3] : memref<8x128xf32, #tpu.memory_space<vmem>>, vector<8x128xf32>
    tpu.vector_store %arg2[%c0_2, %c0_3], %7 {strides = array<i32>} : memref<8x128xf32, #tpu.memory_space<vmem>>, vector<8x128xf32>,
    return
  }
  func.func @transform_0(%arg0: i32) -> (i32, i32) {
    %c0_i32 = arith.constant 0 : i32
    %c0_i32_0 = arith.constant 0 : i32
    return %arg0, %c0_i32 : i32, i32
  }
  func.func @transform_1(%arg0: i32) -> (i32, i32) {
    %c0_i32 = arith.constant 0 : i32
    %c0_i32_0 = arith.constant 0 : i32
    return %arg0, %c0_i32 : i32, i32
  }
}

</mosaic_0001>

<bundles_post_ra>
// kernel: tpu_custom_call.1
= control target key start
LH: loop header
LB: loop body
LE: loop exit
PB: predicated region body
PF: predicated region fallthrough
CT: control target
= control target key end

     0   :  { %6 = vsyncpa [#allocation3], 0  ;;  %s538_s0 = inlined_call_operand.hbm [shape: f32[16,128], index: 0, kind: input, shape index: {}]   ;;  %s539_s1 = inlined_call_operand.hbm [shape: f32[16,128], index: 1, kind: output, shape index: {}]  }
   0x1   :  { %8 = vsyncpa [#allocation3 + $0x1], 0 }
   0x2   :  { %9 = vsyncpa [#allocation4], 0 }
   0x3   :  { %11 = vsyncpa [#allocation4 + $0x1], 0  ;;  %s411_s6 = smov 0   ;;  %s413_s7 = smov 0  }
   0x4   :  { %s415_s8 = smov 0   ;;  %s417_s9 = smov 0  }
   0x5 LB: > { %s432_s10 = sadd.s32 4294967295, %s399_s9   ;;  %s241_s11 = sadd.s32 4294967294, %s399_s9   ;;  %s399_s9 = sphi %s417_s9, %s549_s9   ;;  %s395_s8 = sphi %s415_s8, %s548_s8   ;;  %s391_s7 = sphi %s413_s7, %s547_s7   ;;  %s387_s6 = sphi %s411_s6, %s546_s6  }
   0x6   : > { %s436_s12 = sadd.s32 1, %s399_s9   ;;  %s24_s13 = sadd.s32 1, %s395_s8 }
   0x7   : > { %s21_s14 = ssub.s32 %s399_s9, %s436_s12  ;;  %p31_p0 = scmp.ne.s32.totalorder %s395_s8, %s391_s7 }
   0x8   : > { %p22_p1 = scmp.eq.s32.totalorder %s21_s14, 0  ;;  %p32_p2 = scmp.eq.s32.totalorder %s399_s9, 0 }
   0x9   : > { %p37_p3 = scmp.ne.s32.totalorder %s391_s7, %s387_s6  ;;  %p38_p4 = scmp.eq.s32.totalorder %s432_s10, 0 }
   0xa   : > { %s448_s15 = scalar_select %p22_p1, %s395_s8, %s24_s13  }
   0xb   : > { %p450_p5 = por %p32_p2, %p31_p0  ;;  %p454_p6 = por %p38_p4, %p37_p3 }
   0xc   : > { %p61_p7 = scmp.eq.s32.totalorder %s432_s10, 1  ;;  %p67_p8 = scmp.eq.s32.totalorder %s241_s11, 1 }
   0xd   : > { %p265_p10 = scmp.lt.s32.totalorder %s399_s9, 2  ;;  %s87_s20 = sand.u32 1, %s395_s8  }
   0xe   : > { %p461_p11 = por %p61_p7, %p31_p0  ;;  %p465_p12 = por %p67_p8, %p37_p3 }
   0xf   : > { %s245_s21 = sshll.u32 %s399_s9, 3  ;;  %s244_s22 = sshll.u32 %s87_s20, 3 }
  0x10   : > { %s95_s25 = scalar_lea.hbm %s538_s0, %s245_s21  ;;  %s91_s27 = scalar_lea.vmem [#allocation2], %s244_s22 }
  0x11   : > { %s97_s26 = sshll.u32 %s95_s25, 4  ;;  %s99_s28 = sshll.u32 %s91_s27, 4  ;;  %s98_s26 = int_to_ptr.hbm [resolvable:$true] %s97_s26  ;;  %s100_s28 = int_to_ptr.vmem [resolvable:$true] %s99_s28 }
  0x12   : > { %p476_p13 = pnand %p265_p10, %p450_p5  ;;  %p246_p0 = scmp.ge.s32.totalorder %s399_s9, 1 }
  0x13   : > { %p104_p1 = scmp.lt.s32.totalorder %s399_s9, 3  ;;  %s88_s30 = scalar_lea.sflag [#allocation3], %s87_s20 }
  0x14   : > { %s303_s2 = sshra.s32 %s98_s26, 4  ;;  %p307_p3 = pneg %p476_p13  ;;  %s304_s2 = int_to_ptr.hbm [resolvable:$true] %s303_s2 }
  0x15   : > { %s305_s3 = scalar_lea.hbm %s304_s2, 8  ;;  %s310_s11 = scalar_lea.hbm %s538_s0, 16 }
  0x16   : > { %p306_p2 = scmp.ne.s32.totalorder %s304_s2, %s305_s3  ;;  %p311_p5 = scmp.lt.s32.totalorder %s304_s2, %s538_s0 }
  0x17   : > { %p312_p8 = scmp.lt.s32.totalorder %s310_s11, %s305_s3 }
  0x18   : > { %p308_p4 = pnand %p307_p3, %p306_p2 }
  0x19   : > { %p313_p10 = por %p312_p8, %p311_p5 }
  0x1a   : > { %p309_p7 = pneg %p308_p4 }
  0x1c   : > { %p314_p9 = pnand %p313_p10, %p309_p7 }
  0x1e   : > { %317 = shalt.err (!%p314_p9)
}
  0x1f   : > { %260 = dma.hbm_to_vmem [thread:$0]  (!%p476_p13), %s98_s26, 128, %s100_s28, %s88_s30  }
  0x20   : > { %p105_p2 = pnand %p246_p0, %p104_p1 }
  0x21   : > { %s497_s16 = sand.u32 (!%p105_p2), 1, %s391_s7  }
  0x22   : > { %108 = sbr.rel (%p105_p2) target bundleno = 76 (0x4c), region = 24  ;;  %s247_s20 = sshll.u32 (!%p105_p2), %s497_s16, 3 }
  0x23   : > { %s111_s21 = scalar_lea.sflag (!%p105_p2), [#allocation3], %s497_s16  ;;  %s114_s22 = scalar_lea.vmem (!%p105_p2), [#allocation2], %s247_s20 }
  0x27   : > { %378 = dma.done.wait (%p454_p6), %s111_s21, 128  }
  0x28   : > { %380 = vsyncadd (%p454_p6), %s111_s21, 4294967168  ;;  %v134_v0 = vld [vmem:[%s114_s22] sm:$0xff]  ;;  %s250_s23 = sshll.u32 %s432_s10, 3  ;;  %s133_s26 = scalar_lea.vmem [#allocation5], %s247_s20 }
  0x29   : > { %v135_v1 = vsub.f32 0.0, %v134_v0  ;;  %s166_s25 = scalar_lea.hbm %s539_s1, %s250_s23  ;;  %s168_s27 = sshll.u32 %s133_s26, 4  ;;  %s169_s27 = int_to_ptr.vmem [resolvable:$true] %s168_s27 }
  0x2a   : > { %s170_s28 = sshll.u32 %s166_s25, 4  ;;  %s156_s10 = scalar_lea.sflag [#allocation4], %s497_s16  ;;  %s171_s28 = int_to_ptr.hbm [resolvable:$true] %s170_s28 }
  0x2b   : > { %v136_v2 = vmul.f32 1.442695, %v135_v1  ;;  %s347_s29 = sshra.s32 %s171_s28, 4  ;;  %s353_s4 = scalar_lea.hbm %s539_s1, 16  ;;  %s348_s29 = int_to_ptr.hbm [resolvable:$true] %s347_s29 }
  0x2c   : > { %s349_s30 = scalar_lea.hbm %s348_s29, 8  ;;  %p354_p0 = scmp.lt.s32.totalorder %s348_s29, %s539_s1 }
  0x2d   : > { %299 = vpow2.f32 %v136_v2  ;;  %p350_p6 = scmp.ne.s32.totalorder %s348_s29, %s349_s30  ;;  %p355_p1 = scmp.lt.s32.totalorder %s353_s4, %s349_s30 }
  0x2f   : > { %p351_p9 = pnand %p350_p6, %p461_p11  ;;  %p356_p3 = por %p355_p1, %p354_p0 }
  0x31   : > { %p352_p13 = pneg %p351_p9 }
  0x33   : > { %v300_v3 = vpop.eup %299  ;;  %p357_p4 = pnand %p356_p3, %p352_p13 }
  0x34   : > { %v138_v4 = vadd.f32 1.0, %v300_v3 }
  0x36   : > { %301 = vrcp.f32 %v138_v4  ;;  %v150_v7 = vand.u32 2147483648, %v138_v4  ;;  %vm144_vm0 = vweird.f32 %v138_v4  ;;  %v148_v9 = vand.u32 2147483647, %v138_v4 }
  0x38   : > { %v151_v11 = vor.u32 1.1754944e-38, %v150_v7  ;;  %vm149_vm3 = vcmp.eq.f32.partialorder %v148_v9, 8.507059e+37 }
  0x3c   : > { %v302_v5 = vpop.eup %301 }
  0x3d   : > { %v140_v6 = vmul.f32 %v302_v5, %v138_v4  ;;  %vm145_vm1 = vweird.f32 %v302_v5 }
  0x3e   : > { %vm146_vm2 = vmor %vm144_vm0, %vm145_vm1 }
  0x3f   : > { %v141_v8 = vsub.f32 1.0, %v140_v6 }
  0x41   : > { %v142_v10 = vmul.f32 %v302_v5, %v141_v8 }
  0x43   : > { %v143_v12 = vadd.f32 %v302_v5, %v142_v10 }
  0x45   : > { %v147_v13 = vsel %vm146_vm2, %v302_v5, %v143_v12 }
  0x46   : > { %v152_v14 = vsel %vm149_vm3, %v151_v11, %v147_v13 }
  0x47   : > { %v153_v15 = vmul.f32 %v152_v14, %v134_v0 }
  0x49   : > { %154 = vst [vmem:[%s133_s26] sm:$0xff] %v153_v15 }
  0x4a   : > { %360 = shalt.err (!%p357_p4)
}
  0x4b   : > { %255 = dma.vmem_to_hbm [thread:$0]  (%p461_p11), %s169_s27, 128, %s171_s28, %s156_s10  }
  0x4c PF: > { %s182_s13 = sand.u32 1, %s387_s6   ;;  %p545_p7 = scmp.ge.s32.totalorder %s399_s9, 2 }
  0x4d   : > { %s183_s14 = scalar_lea.sflag [#allocation4], %s182_s13 }
  0x4e   : > { %p262_p5 = pnand %p545_p7, %p465_p12 }
  0x50   : > { %p263_p8 = pneg %p262_p5 }
  0x52   : > { %382 = dma.done.wait (%p263_p8), %s183_s14, 128  }
  0x53   : > { %384 = vsyncadd (%p263_p8), %s183_s14, 4294967168  ;;  %p14_p10 = scmp.ge.s32.totalorder %s436_s12, 4   ;;  %s546_s6 = smov %s391_s7 }
  0x54   : > { %s547_s7 = smov %s395_s8  ;;  %s548_s8 = smov %s448_s15 }
  0x55   : > { %s549_s9 = smov %s436_s12  ;;  %16 = sbr.rel (!%p14_p10) target bundleno = 5 (0x5), region = 69 }
  0x5a   :  { %189 = vsyncpa [#allocation3], 1 }
  0x5b   :  { %191 = vsyncpa [#allocation3 + $0x1], 1 }
  0x5c   :  { %192 = vsyncpa [#allocation4], 1 }
  0x5d   :  { %194 = vsyncpa [#allocation4 + $0x1], 1 }

</bundles_post_ra>
